<compile_context>
chip_gen: v5e
topology: v5e:2x2
jax: 0.10.0
libtpu: 0.0.40
codegen_flags: <defaults>
</compile_context>

<pallas_src>
import functools

import jax
import jax.numpy as jnp
from jax.experimental import pallas as pl
from jax.experimental.pallas import tpu as pltpu

N_NEURONS = 100    # n_neurons in the reference module
HIDDEN_PAD = 128   # lane-dense padded hidden width


def mine_kernel(x_ref, w1_ref, b1_ref, w2_ref, b2_ref, w3_ref, b3_ref, out_ref, *, n_rows):
    """One grid step = one batch element.

    x_ref block: (1, 2N, 2C) -- rows 0:N joint samples, rows N:2N marginal samples.
    Writes MI_lb partial for this batch element broadcast across a (1, 1, 128) block.
    """
    x = x_ref[0]                                                        # (2N, 2C)

    # Fused MLP over all 2N rows (one pass instead of two).
    h1 = jnp.maximum(
        jnp.dot(x, w1_ref[...], preferred_element_type=jnp.float32) + b1_ref[...], 0.0)
    h2 = jnp.maximum(
        jnp.dot(h1, w2_ref[...], preferred_element_type=jnp.float32) + b2_ref[...], 0.0)

    # Final Linear(128 -> 1) as a VPU multiply + lane reduce (padded lanes of w3 are 0).
    zw = h2 * w3_ref[...]                                               # (2N, 128)
    b3 = b3_ref[...]                                                    # (1, 1)
    inv_n = 1.0 / n_rows

    # Joint branch: mean over rows commutes with the linear layer -> single full reduce.
    m1 = jnp.sum(zw[:n_rows, :], keepdims=True) * inv_n + b3            # (1, 1)

    # Marginal branch: per-row scores are needed for exp().
    z2 = jnp.sum(zw[n_rows:, :], axis=-1, keepdims=True) + b3           # (N, 1)

    # Stable log(mean(exp(z2))).
    mx = jnp.max(z2, keepdims=True)                                     # (1, 1)
    lme = mx + jnp.log(jnp.sum(jnp.exp(z2 - mx), keepdims=True) * inv_n)

    mi = m1 - lme                                                       # (1, 1)
    out_ref[...] = jnp.broadcast_to(mi[None], out_ref.shape)            # lane-dense store


def init_mine_params(key, n_channel):
    """Parameter shapes exactly as MINE.__init__ (PyTorch Linear: weight (out, in))."""
    k1, k2, k3, k4, k5, k6 = jax.random.split(key, 6)
    scale = 0.05
    return {
        "nChannel": n_channel,
        "w1": scale * jax.random.normal(k1, (N_NEURONS, 2 * n_channel), jnp.float32),
        "b1": scale * jax.random.normal(k2, (N_NEURONS,), jnp.float32),
        "w2": scale * jax.random.normal(k3, (N_NEURONS, N_NEURONS), jnp.float32),
        "b2": scale * jax.random.normal(k4, (N_NEURONS,), jnp.float32),
        "w3": scale * jax.random.normal(k5, (1, N_NEURONS), jnp.float32),
        "b3": scale * jax.random.normal(k6, (1,), jnp.float32),
    }


def mine_forward(x, ind, params, perm_key, bsize=1):
    """Forward pass matching MINE.forward(x, ind) — one fused pallas_call over bsize."""
    n_ch = params["nChannel"]
    a, b, c = x.shape
    xf = x.reshape(a * b, c)                  # x.view(x.size(0)*x.size(1), x.size(2))
    n_ind = int(ind.shape[0])
    in_dim = 2 * n_ch

    # --- zero-pad parameters to lane-dense hidden width 128 (glue, done once) -------
    # Padded hidden lanes stay exactly 0: relu(x @ 0 + 0) = 0, and the corresponding
    # rows of w2 / lanes of w3 are 0, so padding never changes the result.
    w1t = jnp.zeros((in_dim, HIDDEN_PAD), jnp.float32).at[:, :N_NEURONS].set(params["w1"].T)
    b1 = jnp.zeros((1, HIDDEN_PAD), jnp.float32).at[:, :N_NEURONS].set(params["b1"][None, :])
    w2t = jnp.zeros((HIDDEN_PAD, HIDDEN_PAD), jnp.float32).at[:N_NEURONS, :N_NEURONS].set(params["w2"].T)
    b2 = jnp.zeros((1, HIDDEN_PAD), jnp.float32).at[:, :N_NEURONS].set(params["b2"][None, :])
    w3r = jnp.zeros((1, HIDDEN_PAD), jnp.float32).at[:, :N_NEURONS].set(params["w3"])
    b3 = params["b3"].reshape(1, 1).astype(jnp.float32)

    # --- index setup / gathers (glue): build the stacked (bsize, 2N, 2C) input ------
    keys = jax.random.split(perm_key, bsize)
    perms = jnp.stack(
        [jax.random.permutation(keys[i], n_ind) for i in range(bsize)], axis=0)  # (bsize, N)
    ind_perm = ind[perms]                                                        # (bsize, N)
    x_joint = xf[ind, :]                                                         # (N, 2C)
    x_marg = jnp.concatenate(
        [jnp.broadcast_to(x_joint[None, :, :n_ch], (bsize, n_ind, n_ch)),
         xf[ind_perm, n_ch:2 * n_ch]],
        axis=2)                                                                  # (bsize, N, 2C)
    x_all = jnp.concatenate(
        [jnp.broadcast_to(x_joint[None, :, :], (bsize, n_ind, in_dim)), x_marg],
        axis=1)                                                                  # (bsize, 2N, 2C)

    kernel = functools.partial(mine_kernel, n_rows=n_ind)
    out = pl.pallas_call(
        kernel,
        out_shape=jax.ShapeDtypeStruct((bsize, 1, HIDDEN_PAD), jnp.float32),
        grid=(bsize,),
        in_specs=[
            pl.BlockSpec((1, 2 * n_ind, in_dim), lambda i: (i, 0, 0)),   # per-batch samples
            pl.BlockSpec((in_dim, HIDDEN_PAD), lambda i: (0, 0)),        # weights: constant
            pl.BlockSpec((1, HIDDEN_PAD), lambda i: (0, 0)),             #  block index -> no
            pl.BlockSpec((HIDDEN_PAD, HIDDEN_PAD), lambda i: (0, 0)),    #  re-DMA per step
            pl.BlockSpec((1, HIDDEN_PAD), lambda i: (0, 0)),
            pl.BlockSpec((1, HIDDEN_PAD), lambda i: (0, 0)),
            pl.BlockSpec((1, 1), lambda i: (0, 0)),
        ],
        out_specs=pl.BlockSpec((1, 1, HIDDEN_PAD), lambda i: (i, 0, 0)),
        compiler_params=pltpu.CompilerParams(dimension_semantics=("parallel",)),
    )(x_all, w1t, b1, w2t, b2, w3r, b3)

    # Tiny final combine in JAX: mean over batch of the per-batch MI partials.
    return jnp.sum(out[:, 0, 0]) / bsize


def mine_forward_ref(x, ind, params, perm_key, bsize=1):
    """Pure-JAX reference (mirrors the PyTorch forward, unpadded, direct formula)."""
    n_ch = params["nChannel"]
    a, b, c = x.shape
    xf = x.reshape(a * b, c)

    def mlp(z):
        h1 = jnp.maximum(z @ params["w1"].T + params["b1"], 0.0)
        h2 = jnp.maximum(h1 @ params["w2"].T + params["b2"], 0.0)
        return h2 @ params["w3"].T + params["b3"]

    mi_lb = 0.0
    keys = jax.random.split(perm_key, bsize)
    for i in range(bsize):
        ind_perm = ind[jax.random.permutation(keys[i], ind.shape[0])]
        z1 = mlp(xf[ind, :])
        z2 = mlp(jnp.concatenate([xf[ind, 0:n_ch], xf[ind_perm, n_ch:2 * n_ch]], axis=1))
        mi_lb += jnp.mean(z1) - jnp.log(jnp.mean(jnp.exp(z2)))
    return mi_lb / bsize


if __name__ == "__main__":
    key = jax.random.PRNGKey(0)
    k_x, k_ind, k_perm, k_params = jax.random.split(key, 4)

    n_channel = 4                                # -> fc1 input dim = 2*nChannel = 8
    x = jax.random.normal(k_x, (2, 64, 2 * n_channel), jnp.float32)     # (A, B, 2C)
    n_rows = x.shape[0] * x.shape[1]             # 128 flattened rows
    ind = jax.random.permutation(k_ind, n_rows)[:64].astype(jnp.int32)  # 64 sampled indices

    params = init_mine_params(k_params, n_channel)

    # bsize = 1 (module default)
    result = jax.block_until_ready(mine_forward(x, ind, params, k_perm, bsize=1))
    expected = jax.block_until_ready(mine_forward_ref(x, ind, params, k_perm, bsize=1))
    assert jnp.allclose(result, expected, atol=1e-5, rtol=1e-5), (result, expected)

    # bsize > 1 exercises the batched grid path (one fused call, weights DMA'd once).
    result_b = jax.block_until_ready(mine_forward(x, ind, params, k_perm, bsize=3))
    expected_b = jax.block_until_ready(mine_forward_ref(x, ind, params, k_perm, bsize=3))
    assert jnp.allclose(result_b, expected_b, atol=1e-5, rtol=1e-5), (result_b, expected_b)

    print("KERNEL_OK")
</pallas_src>

<mosaic_0001>
module attributes {stable_mosaic.version = 11 : i64} {
  func.func @mine_kernel(%arg0: i32, %arg1: memref<1x128x8xf32, #tpu.memory_space<vmem>>, %arg2: memref<8x128xf32, #tpu.memory_space<vmem>>, %arg3: memref<1x128xf32, #tpu.memory_space<vmem>>, %arg4: memref<128x128xf32, #tpu.memory_space<vmem>>, %arg5: memref<1x128xf32, #tpu.memory_space<vmem>>, %arg6: memref<1x128xf32, #tpu.memory_space<vmem>>, %arg7: memref<1x1xf32, #tpu.memory_space<vmem>>, %arg8: memref<1x1x128xf32, #tpu.memory_space<vmem>>) attributes {dimension_semantics = [#tpu.dimension_semantics<parallel>], iteration_bounds = array<i64: 1>, scalar_prefetch = 0 : i64, scratch_operands = 0 : i64, tpu.core_type = #tpu.core_type<tc>, window_params = [{transform_indices = @transform_0, window_bounds = array<i64: 1, 128, 8>}, {pipeline_mode = #tpu.pipeline_mode<synchronous>, transform_indices = @transform_1, window_bounds = array<i64: 8, 128>}, {pipeline_mode = #tpu.pipeline_mode<synchronous>, transform_indices = @transform_2, window_bounds = array<i64: 1, 128>}, {pipeline_mode = #tpu.pipeline_mode<synchronous>, transform_indices = @transform_3, window_bounds = array<i64: 128, 128>}, {pipeline_mode = #tpu.pipeline_mode<synchronous>, transform_indices = @transform_4, window_bounds = array<i64: 1, 128>}, {pipeline_mode = #tpu.pipeline_mode<synchronous>, transform_indices = @transform_5, window_bounds = array<i64: 1, 128>}, {pipeline_mode = #tpu.pipeline_mode<synchronous>, transform_indices = @transform_6, window_bounds = array<i64: 1, 1>}, {transform_indices = @transform_7, window_bounds = array<i64: 1, 1, 128>}]} {
    %c0 = arith.constant 0 : index
    %c0_0 = arith.constant 0 : index
    %c0_1 = arith.constant 0 : index
    %0 = vector.load %arg1[%c0, %c0_0, %c0_1] : memref<1x128x8xf32, #tpu.memory_space<vmem>>, vector<1x128x8xf32>
    %1 = vector.shape_cast %0 : vector<1x128x8xf32> to vector<128x8xf32>
    %c0_2 = arith.constant 0 : index
    %c0_3 = arith.constant 0 : index
    %2 = vector.load %arg2[%c0_2, %c0_3] : memref<8x128xf32, #tpu.memory_space<vmem>>, vector<8x128xf32>
    %cst = arith.constant dense<0.000000e+00> : vector<128x128xf32>
    %3 = tpu.matmul %1, %2, %cst {dimension_numbers = #tpu.dot_dimension_numbers<[1], [0], [0], [1], [0, 0, 1, 1], [], []>} : vector<128x8xf32>, vector<8x128xf32>, vector<128x128xf32> -> vector<128x128xf32>
    %c0_4 = arith.constant 0 : index
    %c0_5 = arith.constant 0 : index
    %4 = vector.load %arg3[%c0_4, %c0_5] : memref<1x128xf32, #tpu.memory_space<vmem>>, vector<1x128xf32>
    %5 = vector.broadcast %4 : vector<1x128xf32> to vector<128x128xf32>
    %6 = arith.addf %3, %5 : vector<128x128xf32>
    %cst_6 = arith.constant 0.000000e+00 : f32
    %7 = vector.broadcast %cst_6 : f32 to vector<128x128xf32>
    %8 = arith.maximumf %6, %7 : vector<128x128xf32>
    %c0_7 = arith.constant 0 : index
    %c0_8 = arith.constant 0 : index
    %9 = vector.load %arg4[%c0_7, %c0_8] : memref<128x128xf32, #tpu.memory_space<vmem>>, vector<128x128xf32>
    %cst_9 = arith.constant dense<0.000000e+00> : vector<128x128xf32>
    %10 = tpu.matmul %8, %9, %cst_9 {dimension_numbers = #tpu.dot_dimension_numbers<[1], [0], [0], [1], [0, 0, 1, 1], [], []>} : vector<128x128xf32>, vector<128x128xf32>, vector<128x128xf32> -> vector<128x128xf32>
    %c0_10 = arith.constant 0 : index
    %c0_11 = arith.constant 0 : index
    %11 = vector.load %arg5[%c0_10, %c0_11] : memref<1x128xf32, #tpu.memory_space<vmem>>, vector<1x128xf32>
    %12 = vector.broadcast %11 : vector<1x128xf32> to vector<128x128xf32>
    %13 = arith.addf %10, %12 : vector<128x128xf32>
    %cst_12 = arith.constant 0.000000e+00 : f32
    %14 = vector.broadcast %cst_12 : f32 to vector<128x128xf32>
    %15 = arith.maximumf %13, %14 : vector<128x128xf32>
    %c0_13 = arith.constant 0 : index
    %c0_14 = arith.constant 0 : index
    %16 = vector.load %arg6[%c0_13, %c0_14] : memref<1x128xf32, #tpu.memory_space<vmem>>, vector<1x128xf32>
    %17 = vector.broadcast %16 : vector<1x128xf32> to vector<128x128xf32>
    %18 = arith.mulf %15, %17 : vector<128x128xf32>
    %c0_15 = arith.constant 0 : index
    %c0_16 = arith.constant 0 : index
    %19 = vector.load %arg7[%c0_15, %c0_16] : memref<1x1xf32, #tpu.memory_space<vmem>>, vector<1x1xf32>
    %20 = vector.extract_strided_slice %18 {offsets = [0, 0], sizes = [64, 128], strides = [1, 1]} : vector<128x128xf32> to vector<64x128xf32>
    %21 = vector.shape_cast %20 : vector<64x128xf32> to vector<1x64x128xf32>
    %cst_17 = arith.constant dense<0.000000e+00> : vector<1xf32>
    %22 = vector.multi_reduction <add>, %21, %cst_17 [1, 2] : vector<1x64x128xf32> to vector<1xf32>
    %23 = vector.shape_cast %22 : vector<1xf32> to vector<1x1x1xf32>
    %24 = vector.extract %23[0, 0, 0] : f32 from vector<1x1x1xf32>
    %25 = vector.broadcast %24 : f32 to vector<1x1xf32>
    %cst_18 = arith.constant 1.562500e-02 : f32
    %26 = vector.broadcast %cst_18 : f32 to vector<1x1xf32>
    %27 = arith.mulf %25, %26 : vector<1x1xf32>
    %28 = arith.addf %27, %19 : vector<1x1xf32>
    %29 = vector.extract_strided_slice %18 {offsets = [64, 0], sizes = [64, 128], strides = [1, 1]} : vector<128x128xf32> to vector<64x128xf32>
    %cst_19 = arith.constant dense<0.000000e+00> : vector<64xf32>
    %30 = vector.multi_reduction <add>, %29, %cst_19 [1] : vector<64x128xf32> to vector<64xf32>
    %31 = vector.shape_cast %30 : vector<64xf32> to vector<64x1xf32>
    %32 = vector.broadcast %19 : vector<1x1xf32> to vector<64x1xf32>
    %33 = arith.addf %31, %32 : vector<64x1xf32>
    %34 = vector.shape_cast %33 : vector<64x1xf32> to vector<1x64x1xf32>
    %cst_20 = arith.constant dense<0xFF800000> : vector<1xf32>
    %35 = vector.multi_reduction <maximumf>, %34, %cst_20 [1, 2] : vector<1x64x1xf32> to vector<1xf32>
    %36 = vector.shape_cast %35 : vector<1xf32> to vector<1x1x1xf32>
    %37 = vector.extract %36[0, 0, 0] : f32 from vector<1x1x1xf32>
    %38 = vector.broadcast %37 : f32 to vector<1x1xf32>
    %39 = vector.broadcast %38 : vector<1x1xf32> to vector<64x1xf32>
    %40 = arith.subf %33, %39 : vector<64x1xf32>
    %41 = math.exp %40 : vector<64x1xf32>
    %42 = vector.shape_cast %41 : vector<64x1xf32> to vector<1x64x1xf32>
    %cst_21 = arith.constant dense<0.000000e+00> : vector<1xf32>
    %43 = vector.multi_reduction <add>, %42, %cst_21 [1, 2] : vector<1x64x1xf32> to vector<1xf32>
    %44 = vector.shape_cast %43 : vector<1xf32> to vector<1x1x1xf32>
    %45 = vector.extract %44[0, 0, 0] : f32 from vector<1x1x1xf32>
    %46 = vector.broadcast %45 : f32 to vector<1x1xf32>
    %cst_22 = arith.constant 1.562500e-02 : f32
    %47 = vector.broadcast %cst_22 : f32 to vector<1x1xf32>
    %48 = arith.mulf %46, %47 : vector<1x1xf32>
    %49 = math.log %48 : vector<1x1xf32>
    %50 = arith.addf %38, %49 : vector<1x1xf32>
    %51 = arith.subf %28, %50 : vector<1x1xf32>
    %52 = vector.shape_cast %51 : vector<1x1xf32> to vector<1x1x1xf32>
    %53 = vector.shape_cast %52 : vector<1x1x1xf32> to vector<1x1x1xf32>
    %54 = vector.broadcast %53 : vector<1x1x1xf32> to vector<1x1x128xf32>
    %c0_23 = arith.constant 0 : index
    %c0_24 = arith.constant 0 : index
    %c0_25 = arith.constant 0 : index
    %55 = vector.load %arg8[%c0_23, %c0_24, %c0_25] : memref<1x1x128xf32, #tpu.memory_space<vmem>>, vector<1x1x128xf32>
    tpu.vector_store %arg8[%c0_23, %c0_24, %c0_25], %54 {strides = array<i32>} : memref<1x1x128xf32, #tpu.memory_space<vmem>>, vector<1x1x128xf32>,
    return
  }
  func.func @transform_0(%arg0: i32) -> (i32, i32, i32) {
    %c0_i32 = arith.constant 0 : i32
    %c0_i32_0 = arith.constant 0 : i32
    %c0_i32_1 = arith.constant 0 : i32
    return %arg0, %c0_i32, %c0_i32_0 : i32, i32, i32
  }
  func.func @transform_1(%arg0: i32) -> (i32, i32) {
    %c0_i32 = arith.constant 0 : i32
    %c0_i32_0 = arith.constant 0 : i32
    %c0_i32_1 = arith.constant 0 : i32
    return %c0_i32, %c0_i32_0 : i32, i32
  }
  func.func @transform_2(%arg0: i32) -> (i32, i32) {
    %c0_i32 = arith.constant 0 : i32
    %c0_i32_0 = arith.constant 0 : i32
    %c0_i32_1 = arith.constant 0 : i32
    return %c0_i32, %c0_i32_0 : i32, i32
  }
  func.func @transform_3(%arg0: i32) -> (i32, i32) {
    %c0_i32 = arith.constant 0 : i32
    %c0_i32_0 = arith.constant 0 : i32
    %c0_i32_1 = arith.constant 0 : i32
    return %c0_i32, %c0_i32_0 : i32, i32
  }
  func.func @transform_4(%arg0: i32) -> (i32, i32) {
    %c0_i32 = arith.constant 0 : i32
    %c0_i32_0 = arith.constant 0 : i32
    %c0_i32_1 = arith.constant 0 : i32
    return %c0_i32, %c0_i32_0 : i32, i32
  }
  func.func @transform_5(%arg0: i32) -> (i32, i32) {
    %c0_i32 = arith.constant 0 : i32
    %c0_i32_0 = arith.constant 0 : i32
    %c0_i32_1 = arith.constant 0 : i32
    return %c0_i32, %c0_i32_0 : i32, i32
  }
  func.func @transform_6(%arg0: i32) -> (i32, i32) {
    %c0_i32 = arith.constant 0 : i32
    %c0_i32_0 = arith.constant 0 : i32
    %c0_i32_1 = arith.constant 0 : i32
    return %c0_i32, %c0_i32_0 : i32, i32
  }
  func.func @transform_7(%arg0: i32) -> (i32, i32, i32) {
    %c0_i32 = arith.constant 0 : i32
    %c0_i32_0 = arith.constant 0 : i32
    %c0_i32_1 = arith.constant 0 : i32
    return %arg0, %c0_i32, %c0_i32_0 : i32, i32, i32
  }
}

</mosaic_0001>

<bundles_post_ra>
// kernel: tpu_custom_call.1
= control target key start
LH: loop header
LB: loop body
LE: loop exit
PB: predicated region body
PF: predicated region fallthrough
CT: control target
= control target key end

     0   :  { %s785_s0 = inlined_call_operand.vmem [shape: f32[1,128,8], index: 0, kind: input, shape index: {}]   ;;  %s786_s1 = inlined_call_operand.vmem [shape: f32[8,128], index: 1, kind: input, shape index: {}]   ;;  %s787_s2 = inlined_call_operand.vmem [shape: f32[1,128], index: 2, kind: input, shape index: {}]   ;;  %s788_s3 = inlined_call_operand.vmem [shape: f32[128,128], index: 3, kind: input, shape index: {}]   ;;  %s789_s4 = inlined_call_operand.vmem [shape: f32[1,128], index: 4, kind: input, shape index: {}]   ;;  %s790_s5 = inlined_call_operand.vmem [shape: f32[1,128], index: 5, kind: input, shape index: {}]   ;;  %s791_s6 = inlined_call_operand.<no memory space> [shape: f32[1,1], index: 6, kind: input, shape index: {}]   ;;  %s792_s7 = inlined_call_operand.hbm [shape: f32[1,1,128], index: 7, kind: output, shape index: {}]  }
   0x1   :  { %v12_v0 = vstv %s791_s6 }
   0x2   :  { %13 = vst [vmem:[#allocation2] sm:$0x1] %v12_v0 }
   0x3   :  { %v45_v1 = vld [vmem:[%s786_s1] sm:$0xff]  ;;  %vm50_vm0 = vcmask 64512  }
   0x4   :  { %v29_v2 = vld [vmem:[%s785_s0] sm:$0xff]  ;;  %114 = vmatpush.msra.mxu0 %v45_v1  ;;  %467 = vmatpush.msra.mxu3 %v45_v1 }
   0x5   :  { %451 = vmatmul.msk.f32.vlgmr.msra.gmra.mxu0 %vm50_vm0, %v29_v2 }
   0x6   :  { %14 = vsyncpa [#allocation4], 0  ;;  %v30_v3 = vld [vmem:[%s785_s0 + $0x8] sm:$0xff]  ;;  %v39_v4 = vld [vmem:[%s785_s0 + $0x50] sm:$0xff]  ;;  %vm348_vm1 = vcmask 7168   ;;  %s559_s21 = smov [#allocation3]  }
   0x7   :  { %461 = vmatmul.msk.f32.vlgmr.msra.gmra.mxu3 %vm50_vm0, %v39_v4  ;;  %v31_v5 = vld [vmem:[%s785_s0 + $0x10] sm:$0xff]  ;;  %v40_v6 = vld [vmem:[%s785_s0 + $0x58] sm:$0xff]  ;;  %v41_v8 = vld [vmem:[%s785_s0 + $0x60] sm:$0xff]  ;;  %s440_s22 = sshll.u32 %s559_s21, 4  ;;  %s442_s25 = sshll.u32 %s792_s7, 4  ;;  %s441_s22 = int_to_ptr.vmem [resolvable:$true] %s440_s22  ;;  %s443_s25 = int_to_ptr.hbm [resolvable:$true] %s442_s25 }
   0x8   :  { %v32_v7 = vld [vmem:[%s785_s0 + $0x18] sm:$0xff]  ;;  %v33_v9 = vld [vmem:[%s785_s0 + $0x20] sm:$0xff]  ;;  %v42_v10 = vld [vmem:[%s785_s0 + $0x68] sm:$0xff] }
   0x9   :  { %v34_v11 = vld [vmem:[%s785_s0 + $0x28] sm:$0xff]  ;;  %v43_v12 = vld [vmem:[%s785_s0 + $0x70] sm:$0xff]  ;;  %v195_v13 = vld [vmem:[%s788_s3 + $0x78] sm:$0xff] }
   0xa   :  { %200 = vmatpush.msra.mxu1 %v195_v13  ;;  %v194_v14 = vld [vmem:[%s788_s3 + $0x70] sm:$0xff]  ;;  %v193_v15 = vld [vmem:[%s788_s3 + $0x68] sm:$0xff]  ;;  %468 = vmatpush.msra.mxu2 %v195_v13  ;;  %v192_v16 = vld [vmem:[%s788_s3 + $0x60] sm:$0xff] }
   0xb   :  { %469 = vmatpush.msrb.mxu3 %v195_v13  ;;  %v35_v17 = vld [vmem:[%s785_s0 + $0x30] sm:$0xff]  ;;  %v44_v18 = vld [vmem:[%s785_s0 + $0x78] sm:$0xff]  ;;  %v189_v21 = vld [vmem:[%s788_s3 + $0x48] sm:$0xff] }
   0xc   :  { %201 = vmatpush.msra.mxu1 %v194_v14  ;;  %470 = vmatpush.msra.mxu2 %v194_v14  ;;  %v191_v19 = vld [vmem:[%s788_s3 + $0x58] sm:$0xff]  ;;  %v190_v20 = vld [vmem:[%s788_s3 + $0x50] sm:$0xff]  ;;  %v188_v22 = vld [vmem:[%s788_s3 + $0x40] sm:$0xff] }
   0xd   :  { %452 = vmatmul.msk.f32.gmra.mxu0 %vm50_vm0, %v30_v3  ;;  %471 = vmatpush.msrb.mxu3 %v194_v14  ;;  %v36_v23 = vld [vmem:[%s785_s0 + $0x38] sm:$0xff]  ;;  %v186_v25 = vld [vmem:[%s788_s3 + $0x30] sm:$0xff]  ;;  %v185_v26 = vld [vmem:[%s788_s3 + $0x28] sm:$0xff] }
   0xe   :  { %202 = vmatpush.msra.mxu1 %v193_v15  ;;  %472 = vmatpush.msra.mxu2 %v193_v15  ;;  %v187_v24 = vld [vmem:[%s788_s3 + $0x38] sm:$0xff]  ;;  %v184_v27 = vld [vmem:[%s788_s3 + $0x20] sm:$0xff]  ;;  %v38_v30 = vld [vmem:[%s785_s0 + $0x48] sm:$0xff] }
   0xf   :  { %462 = vmatmul.msk.f32.gmra.mxu3 %vm50_vm0, %v40_v6  ;;  %v37_v28 = vld [vmem:[%s785_s0 + $0x40] sm:$0xff]  ;;  %v183_v29 = vld [vmem:[%s788_s3 + $0x18] sm:$0xff]  ;;  %v182_v31 = vld [vmem:[%s788_s3 + $0x10] sm:$0xff] }
  0x10   :  { %473 = vmatpush.msrb.mxu3 %v193_v15  ;;  %203 = vmatpush.msra.mxu1 %v192_v16  ;;  %v181_v32 = vld [vmem:[%s788_s3 + $0x8] sm:$0xff]  ;;  %v180_v33 = vld [vmem:[%s788_s3] sm:$0xff] }
  0x11   :  { %474 = vmatpush.msra.mxu2 %v192_v16  ;;  %v510_v34 = vld [vmem:[%s787_s2] ss:$0 sm:$0xff] }
  0x12   :  { %204 = vmatpush.msra.mxu1 %v191_v19  ;;  %475 = vmatpush.msrb.mxu3 %v192_v16 }
  0x13   :  { %476 = vmatpush.msra.mxu2 %v191_v19 }
  0x14   :  { %205 = vmatpush.msra.mxu1 %v190_v20  ;;  %477 = vmatpush.msrb.mxu3 %v191_v19 }
  0x15   :  { %453 = vmatmul.msk.f32.gmra.mxu0 %vm50_vm0, %v31_v5  ;;  %478 = vmatpush.msra.mxu2 %v190_v20 }
  0x16   :  { %206 = vmatpush.msra.mxu1 %v189_v21  ;;  %479 = vmatpush.msrb.mxu3 %v190_v20 }
  0x17   :  { %463 = vmatmul.msk.f32.gmra.mxu3 %vm50_vm0, %v41_v8  ;;  %480 = vmatpush.msra.mxu2 %v189_v21 }
  0x18   :  { %207 = vmatpush.msra.mxu1 %v188_v22  ;;  %481 = vmatpush.msrb.mxu3 %v189_v21 }
  0x19   :  { %482 = vmatpush.msra.mxu2 %v188_v22 }
  0x1a   :  { %208 = vmatpush.msra.mxu1 %v187_v24  ;;  %483 = vmatpush.msrb.mxu3 %v188_v22 }
  0x1b   :  { %484 = vmatpush.msra.mxu2 %v187_v24 }
  0x1c   :  { %209 = vmatpush.msra.mxu1 %v186_v25  ;;  %485 = vmatpush.msrb.mxu3 %v187_v24  ;;  %v511_v24 = vld [vmem:[%s789_s4] ss:$0 sm:$0xff] }
  0x1d   :  { %454 = vmatmul.msk.f32.gmra.mxu0 %vm50_vm0, %v32_v7  ;;  %486 = vmatpush.msra.mxu2 %v186_v25 }
  0x1e   :  { %210 = vmatpush.msra.mxu1 %v185_v26  ;;  %487 = vmatpush.msrb.mxu3 %v186_v25 }
  0x1f   :  { %464 = vmatmul.msk.f32.gmra.mxu3 %vm50_vm0, %v42_v10  ;;  %488 = vmatpush.msra.mxu2 %v185_v26 }
  0x20   :  { %211 = vmatpush.msra.mxu1 %v184_v27  ;;  %489 = vmatpush.msrb.mxu3 %v185_v26 }
  0x21   :  { %490 = vmatpush.msra.mxu2 %v184_v27 }
  0x22   :  { %212 = vmatpush.msra.mxu1 %v183_v29  ;;  %491 = vmatpush.msrb.mxu3 %v184_v27  ;;  %v729_v27 = vld [vmem:[%s790_s5] ss:$0 sm:$0xff] }
  0x23   :  { %492 = vmatpush.msra.mxu2 %v183_v29 }
  0x24   :  { %493 = vmatpush.msrb.mxu3 %v183_v29  ;;  %213 = vmatpush.msra.mxu1 %v182_v31 }
  0x25   :  { %455 = vmatmul.msk.f32.gmra.mxu0 %vm50_vm0, %v33_v9  ;;  %494 = vmatpush.msra.mxu2 %v182_v31 }
  0x26   :  { %495 = vmatpush.msrb.mxu3 %v182_v31  ;;  %214 = vmatpush.msra.mxu1 %v181_v32 }
  0x27   :  { %465 = vmatmul.msk.f32.gmra.mxu3 %vm50_vm0, %v43_v12  ;;  %496 = vmatpush.msra.mxu2 %v181_v32 }
  0x28   :  { %497 = vmatpush.msrb.mxu3 %v181_v32  ;;  %215 = vmatpush.msra.mxu1 %v180_v33 }
  0x29   :  { %498 = vmatpush.msra.mxu2 %v180_v33 }
  0x2a   :  { %499 = vmatpush.msrb.mxu3 %v180_v33 }
  0x2d   :  { %456 = vmatmul.msk.f32.gmra.mxu0 %vm50_vm0, %v34_v11 }
  0x2f   :  { %466 = vmatmul.msk.f32.gmra.mxu3 %vm50_vm0, %v44_v18 }
  0x35   :  { %457 = vmatmul.msk.f32.gmra.mxu0 %vm50_vm0, %v35_v17 }
  0x3d   :  { %458 = vmatmul.msk.f32.gmra.mxu0 %vm50_vm0, %v36_v23 }
  0x45   :  { %459 = vmatmul.msk.f32.gmra.mxu0 %vm50_vm0, %v37_v28 }
  0x4d   :  { %460 = vmatmul.msk.f32.gmra.mxu0 %vm50_vm0, %v38_v30 }
  0x82   :  { %v116_v35 = vpop.f32.mrf.mxu0 }
  0x83   :  { %v117_v36 = vadd.f32 %v510_v34, %v116_v35 }
  0x85   :  { %v164_v37 = vmax.f32 %v117_v36, 0.0 }
  0x87   :  { %216 = vmatmul.f32.vlgmr.msra.gmra.mxu1 %v164_v37 }
  0x8a   :  { %v119_v38 = vpop.f32.mrf.mxu0  ;;  %v146_v42 = vpop.f32.mrf.mxu3 }
  0x8b   :  { %v120_v39 = vadd.f32 %v510_v34, %v119_v38  ;;  %v147_v13 = vadd.f32 %v510_v34, %v146_v42 }
  0x8d   :  { %v165_v40 = vmax.f32 %v120_v39, 0.0  ;;  %v174_v14 = vmax.f32 %v147_v13, 0.0 }
  0x8f   :  { %219 = vmatmul.f32.gmra.mxu1 %v165_v40 }
  0x92   :  { %v122_v41 = vpop.f32.mrf.mxu0  ;;  %v149_v46 = vpop.f32.mrf.mxu3 }
  0x93   :  { %v123_v43 = vadd.f32 %v510_v34, %v122_v41  ;;  %v150_v15 = vadd.f32 %v510_v34, %v149_v46 }
  0x95   :  { %v166_v44 = vmax.f32 %v123_v43, 0.0  ;;  %v175_v16 = vmax.f32 %v150_v15, 0.0 }
  0x97   :  { %222 = vmatmul.f32.gmra.mxu1 %v166_v44 }
  0x9a   :  { %v125_v45 = vpop.f32.mrf.mxu0  ;;  %v152_v50 = vpop.f32.mrf.mxu3 }
  0x9b   :  { %v126_v47 = vadd.f32 %v510_v34, %v125_v45  ;;  %v153_v17 = vadd.f32 %v510_v34, %v152_v50 }
  0x9d   :  { %v167_v48 = vmax.f32 %v126_v47, 0.0  ;;  %v176_v18 = vmax.f32 %v153_v17, 0.0 }
  0x9f   :  { %225 = vmatmul.f32.gmra.mxu1 %v167_v48 }
  0xa2   :  { %v128_v49 = vpop.f32.mrf.mxu0  ;;  %v155_v54 = vpop.f32.mrf.mxu3 }
  0xa3   :  { %v129_v51 = vadd.f32 %v510_v34, %v128_v49  ;;  %v156_v56 = vadd.f32 %v510_v34, %v155_v54 }
  0xa5   :  { %v168_v52 = vmax.f32 %v129_v51, 0.0  ;;  %v177_v58 = vmax.f32 %v156_v56, 0.0 }
  0xa7   :  { %228 = vmatmul.f32.gmra.mxu1 %v168_v52  ;;  %255 = vmatmul.f32.vlgmr.msrb.gmra.mxu3 %v177_v58 }
  0xaa   :  { %v131_v53 = vpop.f32.mrf.mxu0  ;;  %v158_v60 = vpop.f32.mrf.mxu3 }
  0xab   :  { %v132_v55 = vadd.f32 %v510_v34, %v131_v53  ;;  %v159_v62 = vadd.f32 %v510_v34, %v158_v60 }
  0xad   :  { %v169_v57 = vmax.f32 %v132_v55, 0.0  ;;  %v178_v0 = vmax.f32 %v159_v62, 0.0 }
  0xaf   :  { %231 = vmatmul.f32.gmra.mxu1 %v169_v57  ;;  %258 = vmatmul.f32.gmra.mxu3 %v178_v0 }
  0xb2   :  { %v134_v59 = vpop.f32.mrf.mxu0  ;;  %v161_v4 = vpop.f32.mrf.mxu3 }
  0xb3   :  { %v135_v61 = vadd.f32 %v510_v34, %v134_v59  ;;  %v162_v5 = vadd.f32 %v510_v34, %v161_v4 }
  0xb5   :  { %v170_v63 = vmax.f32 %v135_v61, 0.0  ;;  %v179_v7 = vmax.f32 %v162_v5, 0.0 }
  0xb7   :  { %234 = vmatmul.f32.vlgmr.msra.gmra.mxu2 %v170_v63  ;;  %261 = vmatmul.f32.gmra.mxu3 %v179_v7 }
  0xba   :  { %v137_v1 = vpop.f32.mrf.mxu0 }
  0xbb   :  { %v138_v2 = vadd.f32 %v510_v34, %v137_v1 }
  0xbd   :  { %v171_v3 = vmax.f32 %v138_v2, 0.0 }
  0xbf   :  { %237 = vmatmul.f32.gmra.mxu2 %v171_v3 }
  0xc2   :  { %v140_v6 = vpop.f32.mrf.mxu0 }
  0xc3   :  { %v141_v8 = vadd.f32 %v510_v34, %v140_v6 }
  0xc5   :  { %v172_v9 = vmax.f32 %v141_v8, 0.0 }
  0xc7   :  { %240 = vmatmul.f32.gmra.mxu2 %v172_v9 }
  0xca   :  { %v143_v10 = vpop.f32.mrf.mxu0 }
  0xcb   :  { %v144_v11 = vadd.f32 %v510_v34, %v143_v10 }
  0xcd   :  { %v173_v12 = vmax.f32 %v144_v11, 0.0 }
  0xcf   :  { %243 = vmatmul.f32.gmra.mxu2 %v173_v12 }
  0xd7   :  { %246 = vmatmul.f32.gmra.mxu2 %v174_v14 }
  0xdf   :  { %249 = vmatmul.f32.gmra.mxu2 %v175_v16 }
  0xe7   :  { %252 = vmatmul.f32.gmra.mxu2 %v176_v18 }
 0x104   :  { %v217_v19 = vpop.f32.mrf.mxu1 }
 0x105   :  { %v218_v52 = vadd.f32 %v511_v24, %v217_v19 }
 0x107   :  { %v265_v59 = vmax.f32 %v218_v52, 0.0 }
 0x109   :  { %v285_v6 = vmul.f32 %v729_v27, %v265_v59 }
 0x10c   :  { %v220_v22 = vpop.f32.mrf.mxu1 }
 0x10d   :  { %v221_v50 = vadd.f32 %v511_v24, %v220_v22 }
 0x10f   :  { %v266_v55 = vmax.f32 %v221_v50, 0.0 }
 0x111   :  { %v286_v1 = vmul.f32 %v729_v27, %v266_v55 }
 0x113   :  { %v302_v10 = vadd.f32 %v286_v1, %v285_v6 }
 0x114   :  { %v223_v28 = vpop.f32.mrf.mxu1 }
 0x115   :  { %v224_v53 = vadd.f32 %v511_v24, %v223_v28 }
 0x117   :  { %v267_v61 = vmax.f32 %v224_v53, 0.0 }
 0x119   :  { %v287_v7 = vmul.f32 %v729_v27, %v267_v61 }
 0x11b   :  { %v303_v15 = vadd.f32 %v302_v10, %v287_v7 }
 0x11c   :  { %v226_v36 = vpop.f32.mrf.mxu1 }
 0x11d   :  { %v227_v57 = vadd.f32 %v511_v24, %v226_v36 }
 0x11f   :  { %v268_v2 = vmax.f32 %v227_v57, 0.0 }
 0x121   :  { %v288_v11 = vmul.f32 %v729_v27, %v268_v2 }
 0x123   :  { %v304_v18 = vadd.f32 %v303_v15, %v288_v11 }
 0x124   :  { %v229_v44 = vpop.f32.mrf.mxu1 }
 0x125   :  { %v230_v62 = vadd.f32 %v511_v24, %v229_v44 }
 0x127   :  { %v269_v8 = vmax.f32 %v230_v62, 0.0 }
 0x129   :  { %v289_v16 = vmul.f32 %v729_v27, %v269_v8 }
 0x12a   :  { %v256_v23 = vpop.f32.mrf.mxu3 }
 0x12b   :  { %v257_v4 = vadd.f32 %v511_v24, %v256_v23 }
 0x12c   :  { %v232_v60 = vpop.f32.mrf.mxu1 }
 0x12d   :  { %v233_v3 = vadd.f32 %v511_v24, %v232_v60  ;;  %v278_v14 = vmax.f32 %v257_v4, 0.0 }
 0x12f   :  { %v270_v12 = vmax.f32 %v233_v3, 0.0  ;;  %v298_v23 = vmul.f32 %v729_v27, %v278_v14 }
 0x131   :  { %v290_v19 = vmul.f32 %v729_v27, %v270_v12 }
 0x132   :  { %v259_v32 = vpop.f32.mrf.mxu3 }
 0x133   :  { %v260_v35 = vadd.f32 %v511_v24, %v259_v32 }
 0x135   :  { %v279_v38 = vmax.f32 %v260_v35, 0.0  ;;  %v513_v35 = vld [vmem:[#allocation2] ss:$0 sm:$0xff] }
 0x137   :  { %v299_v42 = vmul.f32 %v729_v27, %v279_v38 }
 0x13a   :  { %v235_v20 = vpop.f32.mrf.mxu2  ;;  %v262_v46 = vpop.f32.mrf.mxu3 }
 0x13b   :  { %v263_v49 = vadd.f32 %v511_v24, %v262_v46  ;;  %v236_v9 = vadd.f32 %v511_v24, %v235_v20  ;;  %v305_v20 = vadd.f32 %v304_v18, %v289_v16 }
 0x13d   :  { %v280_v54 = vmax.f32 %v263_v49, 0.0  ;;  %v271_v17 = vmax.f32 %v236_v9, 0.0 }
 0x13f   :  { %v300_v0 = vmul.f32 %v729_v27, %v280_v54 }
 0x142   :  { %v721_v21 = vpop.f32.mrf.mxu2 }
 0x143   :  { %v239_v13 = vadd.f32 %v511_v24, %v721_v21 }
 0x145   :  { %v272_v22 = vmax.f32 %v239_v13, 0.0 }
 0x147   :  { %v292_v28 = vmul.f32 %v729_v27, %v272_v22 }
 0x14a   :  { %v241_v25 = vpop.f32.mrf.mxu2 }
 0x14b   :  { %v242_v26 = vadd.f32 %v511_v24, %v241_v25  ;;  %v291_v25 = vmul.f32 %v729_v27, %v271_v17 }
 0x14d   :  { %v273_v29 = vmax.f32 %v242_v26, 0.0  ;;  %v306_v26 = vadd.f32 %v305_v20, %v290_v19 }
 0x14f   :  { %v293_v30 = vmul.f32 %v729_v27, %v273_v29  ;;  %v307_v29 = vadd.f32 %v306_v26, %v291_v25 }
 0x151   :  { %321 = vadd.xlane.f32.xlu0 %v293_v30  ;;  %v308_v21 = vadd.f32 %v307_v29, %v292_v28 }
 0x152   :  { %v244_v31 = vpop.f32.mrf.mxu2 }
 0x153   :  { %v245_v33 = vadd.f32 %v511_v24, %v244_v31 }
 0x155   :  { %v274_v34 = vmax.f32 %v245_v33, 0.0 }
 0x157   :  { %v294_v37 = vmul.f32 %v729_v27, %v274_v34 }
 0x159   :  { %323 = vadd.xlane.f32.xlu0 %v294_v37 }
 0x15a   :  { %v247_v39 = vpop.f32.mrf.mxu2 }
 0x15b   :  { %v248_v40 = vadd.f32 %v511_v24, %v247_v39 }
 0x15d   :  { %v275_v41 = vmax.f32 %v248_v40, 0.0 }
 0x15f   :  { %v295_v43 = vmul.f32 %v729_v27, %v275_v41 }
 0x161   :  { %325 = vadd.xlane.f32.xlu1 %v295_v43  ;;  %333 = vadd.xlane.f32.xlu0 %v299_v42 }
 0x162   :  { %v250_v45 = vpop.f32.mrf.mxu2 }
 0x163   :  { %v251_v47 = vadd.f32 %v511_v24, %v250_v45 }
 0x165   :  { %v276_v48 = vmax.f32 %v251_v47, 0.0 }
 0x167   :  { %v296_v51 = vmul.f32 %v729_v27, %v276_v48 }
 0x169   :  { %327 = vadd.xlane.f32.xlu1 %v296_v51 }
 0x16a   :  { %v253_v56 = vpop.f32.mrf.mxu2 }
 0x16b   :  { %v254_v58 = vadd.f32 %v511_v24, %v253_v56 }
 0x16d   :  { %v277_v63 = vmax.f32 %v254_v58, 0.0 }
 0x16f   :  { %v297_v5 = vmul.f32 %v729_v27, %v277_v63 }
 0x171   :  { %329 = vadd.xlane.f32.xlu2 %v297_v5  ;;  %335 = vadd.xlane.f32.xlu1 %v300_v0 }
 0x179   :  { %331 = vadd.xlane.f32.xlu2 %v298_v23 }
 0x181   :  { %309 = vadd.xlane.f32.xlu2 %v308_v21 }
 0x1c4   :  { %v322_v24 = vpop.xlane.xlu0 %321 }
 0x1c5   :  { %v340_v42 = vadd.f32 %v513_v35, %v322_v24 }
 0x1c7   :  { %v349_v51 = vsel %vm348_vm1, %v340_v42, -inf }
 0x1cc   :  { %v324_v31 = vpop.xlane.xlu0 %323 }
 0x1cd   :  { %v341_v27 = vadd.f32 %v513_v35, %v324_v31 }
 0x1cf   :  { %v350_v52 = vsel %vm348_vm1, %v341_v27, -inf }
 0x1d4   :  { %v326_v30 = vpop.xlane.xlu1 %325  ;;  %v334_v36 = vpop.xlane.xlu0 %333 }
 0x1d5   :  { %v342_v38 = vadd.f32 %v513_v35, %v326_v30  ;;  %v346_v39 = vadd.f32 %v513_v35, %v334_v36 }
 0x1d7   :  { %v351_v44 = vsel %vm348_vm1, %v342_v38, -inf  ;;  %v357_v46 = vsel %vm348_vm1, %v346_v39, -inf }
 0x1d8   :  { %v358_v54 = vmax.f32 %v351_v44, %v357_v46 }
 0x1dc   :  { %v328_v32 = vpop.xlane.xlu1 %327 }
 0x1dd   :  { %v343_v40 = vadd.f32 %v513_v35, %v328_v32 }
 0x1df   :  { %v352_v47 = vsel %vm348_vm1, %v343_v40, -inf }
 0x1e4   :  { %v330_v33 = vpop.xlane.xlu2 %329  ;;  %v336_v34 = vpop.xlane.xlu1 %335 }
 0x1e5   :  { %v748_v37 = vadd.f32 %v513_v35, %v336_v34  ;;  %v344_v41 = vadd.f32 %v513_v35, %v330_v33 }
 0x1e7   :  { %v359_v43 = vsel %vm348_vm1, %v748_v37, -inf  ;;  %v353_v48 = vsel %vm348_vm1, %v344_v41, -inf }
 0x1e8   :  { %v360_v50 = vmax.f32 %v352_v47, %v359_v43  ;;  %v354_v55 = vmax.f32 %v349_v51, %v353_v48 }
 0x1ea   :  { %v362_v58 = vmax.f32 %v358_v54, %v360_v50 }
 0x1ec   :  { %v332_v45 = vpop.xlane.xlu2 %331 }
 0x1ed   :  { %v345_v49 = vadd.f32 %v513_v35, %v332_v45 }
 0x1ef   :  { %v355_v53 = vsel %vm348_vm1, %v345_v49, -inf }
 0x1f0   :  { %v356_v56 = vmax.f32 %v350_v52, %v355_v53 }
 0x1f2   :  { %v361_v57 = vmax.f32 %v354_v55, %v356_v56 }
 0x1f4   :  { %v310_v59 = vpop.xlane.xlu2 %309  ;;  %v363_v60 = vmax.f32 %v361_v57, %v362_v58  ;;  %v558_v57 = vmov 0  }
 0x1f5   :  { %v311_v61 = vrot.slane %v310_v59, 4  ;;  %508 = vset.pattern.permute.xlu2 %v558_v57  ;;  %509 = vset.pattern.permute.xlu0 %v558_v57 }
 0x1f6   :  { %364 = vmax.xlane.f32.xlu0 %v363_v60 }
 0x1f7   :  { %v312_v62 = vadd.f32 %v311_v61, %v310_v59 }
 0x1f9   :  { %v313_v63 = vrot.slane %v312_v62, 2 }
 0x1fb   :  { %v314_v0 = vadd.f32 %v313_v63, %v312_v62  ;;  %v301_v63 = vld [vmem:[#allocation2] sm:$0x1] }
 0x1fd   :  { %v315_v1 = vrot.slane %v314_v0, 1 }
 0x1ff   :  { %v316_v2 = vadd.f32 %v315_v1, %v314_v0 }
 0x201   :  { %500 = vpush %v316_v2 }
 0x232   :  { %s759_s4 = spop %500 }
 0x233   :  { %v318_v60 = vstv %s759_s4 }
 0x234   :  { %v319_v61 = vmul.f32 0.015625, %v318_v60 }
 0x236   :  { %v320_v1 = vadd.f32 %v319_v61, %v301_v63 }
 0x269   :  { %v365_v3 = vpop.xlane.xlu0 %364 }
 0x26a   :  { %v366_v4 = vrot.slane %v365_v3, 4 }
 0x26c   :  { %v367_v5 = vmax.f32 %v365_v3, %v366_v4 }
 0x26e   :  { %v368_v6 = vrot.slane %v367_v5, 2 }
 0x270   :  { %v369_v7 = vmax.f32 %v367_v5, %v368_v6 }
 0x272   :  { %v370_v8 = vrot.slane %v369_v7, 1 }
 0x274   :  { %v371_v9 = vmax.f32 %v369_v7, %v370_v8 }
 0x276   :  { %502 = vpush %v371_v9 }
 0x2a7   :  { %s503_s5 = spop %502 }
 0x2a8   :  { %v761_v10 = vstv %s503_s5 }
 0x2a9   :  { %v374_v11 = vsub.f32 %v340_v42, %v761_v10  ;;  %v375_v12 = vsub.f32 %v341_v27, %v761_v10  ;;  %v376_v13 = vsub.f32 %v342_v38, %v761_v10  ;;  %v377_v14 = vsub.f32 %v343_v40, %v761_v10 }
 0x2aa   :  { %v378_v15 = vsub.f32 %v344_v41, %v761_v10  ;;  %v379_v19 = vsub.f32 %v345_v49, %v761_v10  ;;  %v380_v23 = vsub.f32 %v346_v39, %v761_v10  ;;  %v381_v25 = vsub.f32 %v748_v37, %v761_v10 }
 0x2ab   :  { %v382_v16 = vmul.f32 1.442695, %v374_v11  ;;  %v384_v17 = vmul.f32 1.442695, %v375_v12  ;;  %v386_v18 = vmul.f32 1.442695, %v376_v13 }
 0x2ac   :  { %v388_v22 = vmul.f32 1.442695, %v377_v14  ;;  %v390_v20 = vmul.f32 1.442695, %v378_v15  ;;  %v392_v26 = vmul.f32 1.442695, %v379_v19 }
 0x2ad   :  { %514 = vpow2.f32 %v382_v16  ;;  %v394_v28 = vmul.f32 1.442695, %v380_v23  ;;  %v396_v24 = vmul.f32 1.442695, %v381_v25 }
 0x2ae   :  { %516 = vpow2.f32 %v384_v17 }
 0x2af   :  { %518 = vpow2.f32 %v386_v18 }
 0x2b0   :  { %520 = vpow2.f32 %v388_v22 }
 0x2b1   :  { %522 = vpow2.f32 %v390_v20 }
 0x2b2   :  { %524 = vpow2.f32 %v392_v26 }
 0x2b3   :  { %v515_v29 = vpop.eup %514  ;;  %526 = vpow2.f32 %v394_v28 }
 0x2b4   :  { %v517_v21 = vpop.eup %516  ;;  %v398_v30 = vsel %vm348_vm1, %v515_v29, 0.0  ;;  %528 = vpow2.f32 %v396_v24 }
 0x2b5   :  { %v519_v31 = vpop.eup %518  ;;  %v399_v32 = vsel %vm348_vm1, %v517_v21, 0.0 }
 0x2b6   :  { %v521_v33 = vpop.eup %520  ;;  %v400_v34 = vadd.f32 %v399_v32, %v398_v30  ;;  %v401_v35 = vsel %vm348_vm1, %v519_v31, 0.0 }
 0x2b7   :  { %v523_v36 = vpop.eup %522  ;;  %v403_v38 = vsel %vm348_vm1, %v521_v33, 0.0 }
 0x2b8   :  { %v402_v37 = vadd.f32 %v401_v35, %v400_v34  ;;  %v525_v39 = vpop.eup %524  ;;  %v405_v41 = vsel %vm348_vm1, %v523_v36, 0.0 }
 0x2b9   :  { %v527_v42 = vpop.eup %526  ;;  %v407_v43 = vsel %vm348_vm1, %v525_v39, 0.0 }
 0x2ba   :  { %v404_v40 = vadd.f32 %v403_v38, %v402_v37  ;;  %v529_v44 = vpop.eup %528  ;;  %v409_v46 = vsel %vm348_vm1, %v527_v42, 0.0 }
 0x2bb   :  { %v411_v48 = vsel %vm348_vm1, %v529_v44, 0.0 }
 0x2bc   :  { %v406_v27 = vadd.f32 %v405_v41, %v404_v40 }
 0x2be   :  { %v408_v45 = vadd.f32 %v407_v43, %v406_v27 }
 0x2c0   :  { %v410_v47 = vadd.f32 %v409_v46, %v408_v45 }
 0x2c2   :  { %v412_v49 = vadd.f32 %v411_v48, %v410_v47 }
 0x2c4   :  { %413 = vadd.xlane.f32.xlu1 %v412_v49 }
 0x337   :  { %v414_v50 = vpop.xlane.xlu1 %413 }
 0x338   :  { %v415_v51 = vrot.slane %v414_v50, 4 }
 0x33a   :  { %v416_v52 = vadd.f32 %v415_v51, %v414_v50 }
 0x33c   :  { %v417_v53 = vrot.slane %v416_v52, 2 }
 0x33e   :  { %v418_v54 = vadd.f32 %v417_v53, %v416_v52 }
 0x340   :  { %v419_v55 = vrot.slane %v418_v54, 1 }
 0x342   :  { %v420_v56 = vadd.f32 %v419_v55, %v418_v54 }
 0x344   :  { %504 = vpush %v420_v56 }
 0x375   :  { %s505_s20 = spop %504 }
 0x376   :  { %v422_v58 = vstv %s505_s20 }
 0x377   :  { %v423_v59 = vmul.f32 0.015625, %v422_v58 }
 0x379   :  { %530 = vlog2.f32 %v423_v59 }
 0x37f   :  { %v531_v62 = vpop.eup %530 }
 0x380   :  { %v425_v0 = vmul.f32 0.6931472, %v531_v62 }
 0x382   :  { %v426_v2 = vadd.f32 %v425_v0, %v761_v10 }
 0x384   :  { %v427_v3 = vsub.f32 %v320_v1, %v426_v2 }
 0x386   :  { %430 = vperm.xlu2 %508, %v427_v3  }
 0x3e0   :  { %v431_v4 = vpop.permute.xlu2 %430 }
 0x3e1   :  { %v433_v5 = vperm.slane %v431_v4, 0 }
 0x3e3   :  { %434 = vst [vmem:[#allocation3] sm:$0x1] %v433_v5 }
 0x3e4   :  { %445 = dma.vmem_to_hbm [thread:$0]  %s441_s22, 16, %s443_s25, [#allocation4]  }
 0x3e5   :  { %556 = dma.done.wait [#allocation4], 16  }
 0x3e6   :  { %557 = vsyncadd [#allocation4], 4294967280 }
 0x3e7   :  { %450 = vsyncpa [#allocation4], 1 }

</bundles_post_ra>
